<compile_context>
chip_gen: v5e
topology: v5e:2x2
jax: 0.10.0
libtpu: 0.0.40
codegen_flags: <defaults>
</compile_context>

<pallas_src>
import jax
import jax.numpy as jnp
from jax.experimental import pallas as pl
from jax.experimental.pallas import tpu as pltpu

N_REPEAT = 3  # cat([x, x, x], dim=1)


def cat3_relu_kernel(x_ref, o_ref):
    # x_ref: (N, C, A, B, D) in VMEM; o_ref: (N, N_REPEAT*C, A, B, D) in VMEM.
    # relu(cat([x]*n, dim=1)) == cat([relu(x)]*n, dim=1) (elementwise op), so
    # compute ReLU once and write the replicated block with one full store.
    # Axis 1 is a major (untiled) dim -> the concat is tile-aligned copies,
    # no masked sublane stores.
    y = jnp.maximum(x_ref[...], jnp.zeros((), dtype=x_ref.dtype))
    o_ref[...] = jnp.concatenate([y] * N_REPEAT, axis=1)


def cat3_relu(x):
    """relu(concat([x]*N_REPEAT, axis=1)) in one grid-free Pallas invocation."""
    N, C, A, B, D = x.shape
    out_shape = (N, N_REPEAT * C, A, B, D)
    itemsize = jnp.dtype(x.dtype).itemsize
    return pl.pallas_call(
        cat3_relu_kernel,
        out_shape=jax.ShapeDtypeStruct(out_shape, x.dtype),
        in_specs=[pl.BlockSpec(memory_space=pltpu.MemorySpace.VMEM)],
        out_specs=pl.BlockSpec(memory_space=pltpu.MemorySpace.VMEM),
        cost_estimate=pl.CostEstimate(
            flops=x.size,                                   # one ReLU per input elem
            transcendentals=0,
            bytes_accessed=(x.size + N_REPEAT * x.size) * itemsize,
        ),
    )(x)


@jax.jit
def model_forward(x):
    # self.rand = random.randint(0, 1) in the PyTorch module; fixed to 0 here
    # for determinism, so only the first concat_in_dim applies and the later
    # dim-1/2/3 concats fall through the `else x` branches.  The forward then
    # applies relu and returns element 0, i.e. relu(cat([x, x, x], dim=1)).
    # TODO(synk): rand==1 branch (extra concats along dims 1, 2, 3) not implemented.
    return cat3_relu(x)


if __name__ == "__main__":
    key = jax.random.PRNGKey(0)
    x = jax.random.normal(key, (2, 3, 4, 5, 6), dtype=jnp.float32)

    out = jax.block_until_ready(model_forward(x))

    # Reference check against plain JAX semantics of the PyTorch forward.
    ref = jnp.maximum(jnp.concatenate([x, x, x], axis=1), 0.0)
    assert out.shape == (2, 9, 4, 5, 6), out.shape
    assert out.dtype == jnp.float32
    assert jnp.allclose(out, ref), "mismatch vs reference"

    print("KERNEL_OK")
</pallas_src>

<mosaic_0001>
module attributes {stable_mosaic.version = 11 : i64} {
  func.func @cat3_relu_kernel(%arg0: memref<2x3x4x5x6xf32, #tpu.memory_space<vmem>>, %arg1: memref<2x9x4x5x6xf32, #tpu.memory_space<vmem>>) attributes {dimension_semantics = [], scalar_prefetch = 0 : i64, scratch_operands = 0 : i64, tpu.core_type = #tpu.core_type<tc>} {
    %c0 = arith.constant 0 : index
    %c0_0 = arith.constant 0 : index
    %c0_1 = arith.constant 0 : index
    %c0_2 = arith.constant 0 : index
    %c0_3 = arith.constant 0 : index
    %0 = vector.load %arg0[%c0, %c0_0, %c0_1, %c0_2, %c0_3] : memref<2x3x4x5x6xf32, #tpu.memory_space<vmem>>, vector<2x3x4x5x6xf32>
    %cst = arith.constant 0.000000e+00 : f32
    %1 = vector.broadcast %cst : f32 to vector<2x3x4x5x6xf32>
    %2 = arith.maximumf %0, %1 : vector<2x3x4x5x6xf32>
    %3 = tpu.concatenate %2, %2, %2 in 1 : vector<2x3x4x5x6xf32>, vector<2x3x4x5x6xf32>, vector<2x3x4x5x6xf32> -> vector<2x9x4x5x6xf32>
    %c0_4 = arith.constant 0 : index
    %c0_5 = arith.constant 0 : index
    %c0_6 = arith.constant 0 : index
    %c0_7 = arith.constant 0 : index
    %c0_8 = arith.constant 0 : index
    %4 = vector.load %arg1[%c0_4, %c0_5, %c0_6, %c0_7, %c0_8] : memref<2x9x4x5x6xf32, #tpu.memory_space<vmem>>, vector<2x9x4x5x6xf32>
    tpu.vector_store %arg1[%c0_4, %c0_5, %c0_6, %c0_7, %c0_8], %3 {strides = array<i32>} : memref<2x9x4x5x6xf32, #tpu.memory_space<vmem>>, vector<2x9x4x5x6xf32>,
    return
  }
}

</mosaic_0001>

<bundles_post_ra>
// kernel: model_forward.1
= control target key start
LH: loop header
LB: loop body
LE: loop exit
PB: predicated region body
PF: predicated region fallthrough
CT: control target
= control target key end

     0   :  { %vm56_vm0 = vcmask 45056   ;;  %s503_s0 = inlined_call_operand.vmem [shape: f32[2,3,4,5,6], index: 0, kind: input, shape index: {}]   ;;  %s504_s1 = inlined_call_operand.vmem [shape: f32[2,9,4,5,6], index: 1, kind: output, shape index: {}]  }
   0x1   :  { %v8_v0 = vld [vmem:[%s503_s0] sm:$0x1f]  ;;  %v9_v1 = vld [vmem:[%s503_s0 + $0x8] sm:$0x1f]  ;;  %v10_v4 = vld [vmem:[%s503_s0 + $0x10] sm:$0x1f] }
   0x2   :  { %v32_v2 = vmax.f32 %v8_v0, 0.0  ;;  %v33_v3 = vmax.f32 %v9_v1, 0.0  ;;  %v34_v5 = vmax.f32 %v10_v4, 0.0  ;;  %v11_v6 = vld [vmem:[%s503_s0 + $0x18] sm:$0x1f] }
   0x3   :  { %v35_v7 = vmax.f32 %v11_v6, 0.0  ;;  %v12_v8 = vld [vmem:[%s503_s0 + $0x20] sm:$0x1f]  ;;  %v13_v10 = vld [vmem:[%s503_s0 + $0x28] sm:$0x1f] }
   0x4   :  { %57 = vst.msk [vmem:[%s504_s1] sm:$0x1f] %vm56_vm0, %v32_v2  ;;  %v36_v9 = vmax.f32 %v12_v8, 0.0  ;;  %v37_v11 = vmax.f32 %v13_v10, 0.0  ;;  %v14_v12 = vld [vmem:[%s503_s0 + $0x30] sm:$0x1f] }
   0x5   :  { %69 = vst.msk [vmem:[%s504_s1 + $0x60] sm:$0x1f] %vm56_vm0, %v32_v2  ;;  %v38_v13 = vmax.f32 %v14_v12, 0.0  ;;  %v15_v14 = vld [vmem:[%s503_s0 + $0x38] sm:$0x1f] }
   0x6   :  { %81 = vst.msk [vmem:[%s504_s1 + $0xc0] sm:$0x1f] %vm56_vm0, %v32_v2  ;;  %v39_v15 = vmax.f32 %v15_v14, 0.0  ;;  %v16_v16 = vld [vmem:[%s503_s0 + $0x40] sm:$0x1f] }
   0x7   :  { %58 = vst.msk [vmem:[%s504_s1 + $0x8] sm:$0x1f] %vm56_vm0, %v33_v3  ;;  %v40_v17 = vmax.f32 %v16_v16, 0.0  ;;  %v17_v18 = vld [vmem:[%s503_s0 + $0x48] sm:$0x1f] }
   0x8   :  { %70 = vst.msk [vmem:[%s504_s1 + $0x68] sm:$0x1f] %vm56_vm0, %v33_v3  ;;  %v41_v19 = vmax.f32 %v17_v18, 0.0  ;;  %v18_v20 = vld [vmem:[%s503_s0 + $0x50] sm:$0x1f] }
   0x9   :  { %82 = vst.msk [vmem:[%s504_s1 + $0xc8] sm:$0x1f] %vm56_vm0, %v33_v3  ;;  %v42_v21 = vmax.f32 %v18_v20, 0.0  ;;  %v19_v22 = vld [vmem:[%s503_s0 + $0x58] sm:$0x1f] }
   0xa   :  { %59 = vst.msk [vmem:[%s504_s1 + $0x10] sm:$0x1f] %vm56_vm0, %v34_v5  ;;  %v43_v23 = vmax.f32 %v19_v22, 0.0  ;;  %v20_v24 = vld [vmem:[%s503_s0 + $0x60] sm:$0x1f] }
   0xb   :  { %71 = vst.msk [vmem:[%s504_s1 + $0x70] sm:$0x1f] %vm56_vm0, %v34_v5  ;;  %v44_v25 = vmax.f32 %v20_v24, 0.0  ;;  %v21_v26 = vld [vmem:[%s503_s0 + $0x68] sm:$0x1f] }
   0xc   :  { %83 = vst.msk [vmem:[%s504_s1 + $0xd0] sm:$0x1f] %vm56_vm0, %v34_v5  ;;  %v45_v27 = vmax.f32 %v21_v26, 0.0  ;;  %v22_v28 = vld [vmem:[%s503_s0 + $0x70] sm:$0x1f] }
   0xd   :  { %60 = vst.msk [vmem:[%s504_s1 + $0x18] sm:$0x1f] %vm56_vm0, %v35_v7  ;;  %v46_v29 = vmax.f32 %v22_v28, 0.0  ;;  %v23_v30 = vld [vmem:[%s503_s0 + $0x78] sm:$0x1f] }
   0xe   :  { %72 = vst.msk [vmem:[%s504_s1 + $0x78] sm:$0x1f] %vm56_vm0, %v35_v7  ;;  %v47_v31 = vmax.f32 %v23_v30, 0.0  ;;  %v24_v32 = vld [vmem:[%s503_s0 + $0x80] sm:$0x1f] }
   0xf   :  { %84 = vst.msk [vmem:[%s504_s1 + $0xd8] sm:$0x1f] %vm56_vm0, %v35_v7  ;;  %v48_v33 = vmax.f32 %v24_v32, 0.0  ;;  %v25_v34 = vld [vmem:[%s503_s0 + $0x88] sm:$0x1f] }
  0x10   :  { %61 = vst.msk [vmem:[%s504_s1 + $0x20] sm:$0x1f] %vm56_vm0, %v36_v9  ;;  %v49_v35 = vmax.f32 %v25_v34, 0.0  ;;  %v26_v36 = vld [vmem:[%s503_s0 + $0x90] sm:$0x1f] }
  0x11   :  { %73 = vst.msk [vmem:[%s504_s1 + $0x80] sm:$0x1f] %vm56_vm0, %v36_v9  ;;  %v50_v37 = vmax.f32 %v26_v36, 0.0  ;;  %v27_v38 = vld [vmem:[%s503_s0 + $0x98] sm:$0x1f] }
  0x12   :  { %85 = vst.msk [vmem:[%s504_s1 + $0xe0] sm:$0x1f] %vm56_vm0, %v36_v9  ;;  %v51_v39 = vmax.f32 %v27_v38, 0.0  ;;  %v28_v40 = vld [vmem:[%s503_s0 + $0xa0] sm:$0x1f] }
  0x13   :  { %62 = vst.msk [vmem:[%s504_s1 + $0x28] sm:$0x1f] %vm56_vm0, %v37_v11  ;;  %v52_v41 = vmax.f32 %v28_v40, 0.0  ;;  %v29_v42 = vld [vmem:[%s503_s0 + $0xa8] sm:$0x1f] }
  0x14   :  { %74 = vst.msk [vmem:[%s504_s1 + $0x88] sm:$0x1f] %vm56_vm0, %v37_v11  ;;  %v53_v43 = vmax.f32 %v29_v42, 0.0  ;;  %v30_v44 = vld [vmem:[%s503_s0 + $0xb0] sm:$0x1f] }
  0x15   :  { %86 = vst.msk [vmem:[%s504_s1 + $0xe8] sm:$0x1f] %vm56_vm0, %v37_v11  ;;  %v54_v45 = vmax.f32 %v30_v44, 0.0  ;;  %v31_v46 = vld [vmem:[%s503_s0 + $0xb8] sm:$0x1f] }
  0x16   :  { %63 = vst.msk [vmem:[%s504_s1 + $0x30] sm:$0x1f] %vm56_vm0, %v38_v13  ;;  %v55_v47 = vmax.f32 %v31_v46, 0.0 }
  0x17   :  { %75 = vst.msk [vmem:[%s504_s1 + $0x90] sm:$0x1f] %vm56_vm0, %v38_v13 }
  0x18   :  { %87 = vst.msk [vmem:[%s504_s1 + $0xf0] sm:$0x1f] %vm56_vm0, %v38_v13 }
  0x19   :  { %64 = vst.msk [vmem:[%s504_s1 + $0x38] sm:$0x1f] %vm56_vm0, %v39_v15 }
  0x1a   :  { %76 = vst.msk [vmem:[%s504_s1 + $0x98] sm:$0x1f] %vm56_vm0, %v39_v15 }
  0x1b   :  { %88 = vst.msk [vmem:[%s504_s1 + $0xf8] sm:$0x1f] %vm56_vm0, %v39_v15 }
  0x1c   :  { %65 = vst.msk [vmem:[%s504_s1 + $0x40] sm:$0x1f] %vm56_vm0, %v40_v17 }
  0x1d   :  { %77 = vst.msk [vmem:[%s504_s1 + $0xa0] sm:$0x1f] %vm56_vm0, %v40_v17 }
  0x1e   :  { %89 = vst.msk [vmem:[%s504_s1 + $0x100] sm:$0x1f] %vm56_vm0, %v40_v17 }
  0x1f   :  { %66 = vst.msk [vmem:[%s504_s1 + $0x48] sm:$0x1f] %vm56_vm0, %v41_v19 }
  0x20   :  { %78 = vst.msk [vmem:[%s504_s1 + $0xa8] sm:$0x1f] %vm56_vm0, %v41_v19 }
  0x21   :  { %90 = vst.msk [vmem:[%s504_s1 + $0x108] sm:$0x1f] %vm56_vm0, %v41_v19 }
  0x22   :  { %67 = vst.msk [vmem:[%s504_s1 + $0x50] sm:$0x1f] %vm56_vm0, %v42_v21 }
  0x23   :  { %79 = vst.msk [vmem:[%s504_s1 + $0xb0] sm:$0x1f] %vm56_vm0, %v42_v21 }
  0x24   :  { %91 = vst.msk [vmem:[%s504_s1 + $0x110] sm:$0x1f] %vm56_vm0, %v42_v21 }
  0x25   :  { %68 = vst.msk [vmem:[%s504_s1 + $0x58] sm:$0x1f] %vm56_vm0, %v43_v23 }
  0x26   :  { %80 = vst.msk [vmem:[%s504_s1 + $0xb8] sm:$0x1f] %vm56_vm0, %v43_v23 }
  0x27   :  { %92 = vst.msk [vmem:[%s504_s1 + $0x118] sm:$0x1f] %vm56_vm0, %v43_v23 }
  0x28   :  { %93 = vst.msk [vmem:[%s504_s1 + $0x120] sm:$0x1f] %vm56_vm0, %v44_v25 }
  0x29   :  { %105 = vst.msk [vmem:[%s504_s1 + $0x180] sm:$0x1f] %vm56_vm0, %v44_v25 }
  0x2a   :  { %117 = vst.msk [vmem:[%s504_s1 + $0x1e0] sm:$0x1f] %vm56_vm0, %v44_v25 }
  0x2b   :  { %94 = vst.msk [vmem:[%s504_s1 + $0x128] sm:$0x1f] %vm56_vm0, %v45_v27 }
  0x2c   :  { %106 = vst.msk [vmem:[%s504_s1 + $0x188] sm:$0x1f] %vm56_vm0, %v45_v27 }
  0x2d   :  { %118 = vst.msk [vmem:[%s504_s1 + $0x1e8] sm:$0x1f] %vm56_vm0, %v45_v27 }
  0x2e   :  { %95 = vst.msk [vmem:[%s504_s1 + $0x130] sm:$0x1f] %vm56_vm0, %v46_v29 }
  0x2f   :  { %107 = vst.msk [vmem:[%s504_s1 + $0x190] sm:$0x1f] %vm56_vm0, %v46_v29 }
  0x30   :  { %119 = vst.msk [vmem:[%s504_s1 + $0x1f0] sm:$0x1f] %vm56_vm0, %v46_v29 }
  0x31   :  { %96 = vst.msk [vmem:[%s504_s1 + $0x138] sm:$0x1f] %vm56_vm0, %v47_v31 }
  0x32   :  { %108 = vst.msk [vmem:[%s504_s1 + $0x198] sm:$0x1f] %vm56_vm0, %v47_v31 }
  0x33   :  { %120 = vst.msk [vmem:[%s504_s1 + $0x1f8] sm:$0x1f] %vm56_vm0, %v47_v31 }
  0x34   :  { %97 = vst.msk [vmem:[%s504_s1 + $0x140] sm:$0x1f] %vm56_vm0, %v48_v33 }
  0x35   :  { %109 = vst.msk [vmem:[%s504_s1 + $0x1a0] sm:$0x1f] %vm56_vm0, %v48_v33 }
  0x36   :  { %121 = vst.msk [vmem:[%s504_s1 + $0x200] sm:$0x1f] %vm56_vm0, %v48_v33 }
  0x37   :  { %98 = vst.msk [vmem:[%s504_s1 + $0x148] sm:$0x1f] %vm56_vm0, %v49_v35 }
  0x38   :  { %110 = vst.msk [vmem:[%s504_s1 + $0x1a8] sm:$0x1f] %vm56_vm0, %v49_v35 }
  0x39   :  { %122 = vst.msk [vmem:[%s504_s1 + $0x208] sm:$0x1f] %vm56_vm0, %v49_v35 }
  0x3a   :  { %99 = vst.msk [vmem:[%s504_s1 + $0x150] sm:$0x1f] %vm56_vm0, %v50_v37 }
  0x3b   :  { %111 = vst.msk [vmem:[%s504_s1 + $0x1b0] sm:$0x1f] %vm56_vm0, %v50_v37 }
  0x3c   :  { %123 = vst.msk [vmem:[%s504_s1 + $0x210] sm:$0x1f] %vm56_vm0, %v50_v37 }
  0x3d   :  { %100 = vst.msk [vmem:[%s504_s1 + $0x158] sm:$0x1f] %vm56_vm0, %v51_v39 }
  0x3e   :  { %112 = vst.msk [vmem:[%s504_s1 + $0x1b8] sm:$0x1f] %vm56_vm0, %v51_v39 }
  0x3f   :  { %124 = vst.msk [vmem:[%s504_s1 + $0x218] sm:$0x1f] %vm56_vm0, %v51_v39 }
  0x40   :  { %101 = vst.msk [vmem:[%s504_s1 + $0x160] sm:$0x1f] %vm56_vm0, %v52_v41 }
  0x41   :  { %113 = vst.msk [vmem:[%s504_s1 + $0x1c0] sm:$0x1f] %vm56_vm0, %v52_v41 }
  0x42   :  { %125 = vst.msk [vmem:[%s504_s1 + $0x220] sm:$0x1f] %vm56_vm0, %v52_v41 }
  0x43   :  { %102 = vst.msk [vmem:[%s504_s1 + $0x168] sm:$0x1f] %vm56_vm0, %v53_v43 }
  0x44   :  { %114 = vst.msk [vmem:[%s504_s1 + $0x1c8] sm:$0x1f] %vm56_vm0, %v53_v43 }
  0x45   :  { %126 = vst.msk [vmem:[%s504_s1 + $0x228] sm:$0x1f] %vm56_vm0, %v53_v43 }
  0x46   :  { %103 = vst.msk [vmem:[%s504_s1 + $0x170] sm:$0x1f] %vm56_vm0, %v54_v45 }
  0x47   :  { %115 = vst.msk [vmem:[%s504_s1 + $0x1d0] sm:$0x1f] %vm56_vm0, %v54_v45 }
  0x48   :  { %127 = vst.msk [vmem:[%s504_s1 + $0x230] sm:$0x1f] %vm56_vm0, %v54_v45 }
  0x49   :  { %104 = vst.msk [vmem:[%s504_s1 + $0x178] sm:$0x1f] %vm56_vm0, %v55_v47 }
  0x4a   :  { %116 = vst.msk [vmem:[%s504_s1 + $0x1d8] sm:$0x1f] %vm56_vm0, %v55_v47 }
  0x4b   :  { %128 = vst.msk [vmem:[%s504_s1 + $0x238] sm:$0x1f] %vm56_vm0, %v55_v47 }

</bundles_post_ra>
